<compile_context>
chip_gen: v6e
topology: v6e:2x2x1
jax: 0.10.0
libtpu: 0.0.40
codegen_flags: <defaults>
</compile_context>

<pallas_src>
import jax
import jax.numpy as jnp
from jax.experimental import pallas as pl
from jax.experimental.pallas import tpu as pltpu

_LANES = 128
_MASK_DTYPE = [None]  # resolved on first call: jnp.bool_ if supported, else jnp.uint8


def _eltwise_kernel(a_ref, b_ref, c_ref, d_ref, e_ref,
                    add_ref, sub_ref, mul_ref, div_ref,
                    gt_ref, lt_ref, eq_ref):
    a = a_ref[...]
    b = b_ref[...]
    c = c_ref[...]
    d = d_ref[...]
    e = e_ref[...]

    add_ref[...] = a + b                          # torch.add(a, b)
    sub_ref[...] = b - c                          # torch.sub(b, c)
    mul_ref[...] = c * d                          # torch.mul(c, d)
    div_ref[...] = d / (e + jnp.float32(1e-05))   # torch.div(d, e + 1e-5) (exact divide)

    # Comparisons written in the output ref's dtype (bool preferred, uint8 fallback).
    gt_ref[...] = (a > b).astype(gt_ref.dtype)    # a > b
    lt_ref[...] = (b < c).astype(lt_ref.dtype)    # b < c
    eq_ref[...] = (c == d).astype(eq_ref.dtype)   # c == d


def _pick_tile_rows(rows, target):
    """Largest sensible row tile: whole array if small, else a 32-aligned target."""
    if rows <= target:
        return rows                      # full-dim block is always layout-legal
    return max(32, (target // 32) * 32)  # 32-row aligned for 8-bit mask outputs


def _run_pallas(a2, b2, c2, d2, e2, rows, tile_rows, mask_dtype):
    spec = pl.BlockSpec((tile_rows, _LANES), lambda i: (i, 0))
    f32_out = jax.ShapeDtypeStruct((rows, _LANES), jnp.float32)
    mask_out = jax.ShapeDtypeStruct((rows, _LANES), mask_dtype)
    call = pl.pallas_call(
        _eltwise_kernel,
        out_shape=(f32_out, f32_out, f32_out, f32_out,
                   mask_out, mask_out, mask_out),
        grid=(pl.cdiv(rows, tile_rows),),          # partial tail block is masked
        in_specs=[spec] * 5,
        out_specs=[spec] * 7,
        compiler_params=pltpu.CompilerParams(
            dimension_semantics=("parallel",),
            vmem_limit_bytes=32 * 1024 * 1024),
    )
    return call(a2, b2, c2, d2, e2)


def pt_module_forward(a, b, c, d, e, *, tile_rows_target=1024):
    """Elementwise forward matching PtModule.forward semantics."""
    orig_shape = a.shape
    n = a.size
    pad = (-n) % _LANES

    def flat(x):
        x = x.reshape(-1)
        if pad:
            x = jnp.pad(x, (0, pad))     # zero-pad tail; division stays finite (0 / 1e-5)
        return x.reshape(-1, _LANES)

    a2, b2, c2, d2, e2 = map(flat, (a, b, c, d, e))
    rows = a2.shape[0]
    tile_rows = _pick_tile_rows(rows, tile_rows_target)

    # Resolve (once per process) whether this Mosaic build supports native bool
    # outputs; native bool avoids a post-kernel uint8->bool pass over 3 arrays.
    if _MASK_DTYPE[0] is None:
        try:
            outs = _run_pallas(a2, b2, c2, d2, e2, rows, tile_rows, jnp.bool_)
            _MASK_DTYPE[0] = jnp.bool_
        except Exception:
            _MASK_DTYPE[0] = jnp.uint8
            outs = _run_pallas(a2, b2, c2, d2, e2, rows, tile_rows, jnp.uint8)
    else:
        outs = _run_pallas(a2, b2, c2, d2, e2, rows, tile_rows, _MASK_DTYPE[0])

    add_r, sub_r, mul_r, div_r, gt_r, lt_r, eq_r = outs
    if _MASK_DTYPE[0] is not jnp.bool_:
        gt_r = gt_r.astype(jnp.bool_)
        lt_r = lt_r.astype(jnp.bool_)
        eq_r = eq_r.astype(jnp.bool_)

    def unflat(x):
        return x.reshape(-1)[:n].reshape(orig_shape)

    return (unflat(add_r), unflat(sub_r), unflat(mul_r), unflat(div_r),
            unflat(gt_r), unflat(lt_r), unflat(eq_r))


def _reference(a, b, c, d, e):
    return (
        a + b,
        b - c,
        c * d,
        d / (e + 1e-05),
        a > b,
        b < c,
        c == d,
    )


def _check(outs, ref):
    for got, want in zip(outs, ref):
        assert got.dtype == want.dtype, (got.dtype, want.dtype)
        assert got.shape == want.shape, (got.shape, want.shape)
        if got.dtype == jnp.bool_:
            assert bool(jnp.all(got == want))
        else:
            assert bool(jnp.allclose(got, want, rtol=1e-6, atol=1e-6))


if __name__ == "__main__":
    key = jax.random.PRNGKey(0)

    # Case 1: the canonical small NCHW example (2048 elems -> one 16x128 block).
    shape = (2, 4, 16, 16)
    ka, kb, kc, kd, ke = jax.random.split(key, 5)
    a = jax.random.normal(ka, shape, dtype=jnp.float32)
    b = jax.random.normal(kb, shape, dtype=jnp.float32)
    c = jax.random.normal(kc, shape, dtype=jnp.float32)
    d = jax.random.normal(kd, shape, dtype=jnp.float32)
    e = jax.random.normal(ke, shape, dtype=jnp.float32)

    outs = jax.block_until_ready(pt_module_forward(a, b, c, d, e))
    _check(outs, _reference(a, b, c, d, e))

    # Case 2: a shape whose element count is NOT a multiple of 128,
    # exercising the pad-and-slice path (no assert failure on odd shapes).
    shape2 = (2, 3, 7, 5)
    k2 = jax.random.split(jax.random.PRNGKey(1), 5)
    a2 = jax.random.normal(k2[0], shape2, dtype=jnp.float32)
    b2 = jax.random.normal(k2[1], shape2, dtype=jnp.float32)
    c2 = jax.random.normal(k2[2], shape2, dtype=jnp.float32)
    d2 = jax.random.normal(k2[3], shape2, dtype=jnp.float32)
    e2 = jax.random.normal(k2[4], shape2, dtype=jnp.float32)

    outs2 = jax.block_until_ready(pt_module_forward(a2, b2, c2, d2, e2))
    _check(outs2, _reference(a2, b2, c2, d2, e2))

    print("KERNEL_OK")
</pallas_src>

<mosaic_0001>
module attributes {stable_mosaic.version = 11 : i64} {
  func.func @_eltwise_kernel(%arg0: i32, %arg1: memref<16x128xf32, #tpu.memory_space<vmem>>, %arg2: memref<16x128xf32, #tpu.memory_space<vmem>>, %arg3: memref<16x128xf32, #tpu.memory_space<vmem>>, %arg4: memref<16x128xf32, #tpu.memory_space<vmem>>, %arg5: memref<16x128xf32, #tpu.memory_space<vmem>>, %arg6: memref<16x128xf32, #tpu.memory_space<vmem>>, %arg7: memref<16x128xf32, #tpu.memory_space<vmem>>, %arg8: memref<16x128xf32, #tpu.memory_space<vmem>>, %arg9: memref<16x128xf32, #tpu.memory_space<vmem>>, %arg10: memref<16x128xi32, #tpu.memory_space<vmem>>, %arg11: memref<16x128xi32, #tpu.memory_space<vmem>>, %arg12: memref<16x128xi32, #tpu.memory_space<vmem>>) attributes {dimension_semantics = [#tpu.dimension_semantics<parallel>], iteration_bounds = array<i64: 1>, scalar_prefetch = 0 : i64, scratch_operands = 0 : i64, tpu.core_type = #tpu.core_type<tc>, window_params = [{transform_indices = @transform_0, window_bounds = array<i64: 16, 128>}, {transform_indices = @transform_1, window_bounds = array<i64: 16, 128>}, {transform_indices = @transform_2, window_bounds = array<i64: 16, 128>}, {transform_indices = @transform_3, window_bounds = array<i64: 16, 128>}, {transform_indices = @transform_4, window_bounds = array<i64: 16, 128>}, {transform_indices = @transform_5, window_bounds = array<i64: 16, 128>}, {transform_indices = @transform_6, window_bounds = array<i64: 16, 128>}, {transform_indices = @transform_7, window_bounds = array<i64: 16, 128>}, {transform_indices = @transform_8, window_bounds = array<i64: 16, 128>}, {transform_indices = @transform_9, window_bounds = array<i64: 16, 128>}, {transform_indices = @transform_10, window_bounds = array<i64: 16, 128>}, {transform_indices = @transform_11, window_bounds = array<i64: 16, 128>}]} {
    %c0 = arith.constant 0 : index
    %c0_0 = arith.constant 0 : index
    %0 = vector.load %arg1[%c0, %c0_0] : memref<16x128xf32, #tpu.memory_space<vmem>>, vector<16x128xf32>
    %c0_1 = arith.constant 0 : index
    %c0_2 = arith.constant 0 : index
    %1 = vector.load %arg2[%c0_1, %c0_2] : memref<16x128xf32, #tpu.memory_space<vmem>>, vector<16x128xf32>
    %c0_3 = arith.constant 0 : index
    %c0_4 = arith.constant 0 : index
    %2 = vector.load %arg3[%c0_3, %c0_4] : memref<16x128xf32, #tpu.memory_space<vmem>>, vector<16x128xf32>
    %c0_5 = arith.constant 0 : index
    %c0_6 = arith.constant 0 : index
    %3 = vector.load %arg4[%c0_5, %c0_6] : memref<16x128xf32, #tpu.memory_space<vmem>>, vector<16x128xf32>
    %c0_7 = arith.constant 0 : index
    %c0_8 = arith.constant 0 : index
    %4 = vector.load %arg5[%c0_7, %c0_8] : memref<16x128xf32, #tpu.memory_space<vmem>>, vector<16x128xf32>
    %5 = arith.addf %0, %1 : vector<16x128xf32>
    %c0_9 = arith.constant 0 : index
    %c0_10 = arith.constant 0 : index
    %6 = vector.load %arg6[%c0_9, %c0_10] : memref<16x128xf32, #tpu.memory_space<vmem>>, vector<16x128xf32>
    tpu.vector_store %arg6[%c0_9, %c0_10], %5 {strides = array<i32>} : memref<16x128xf32, #tpu.memory_space<vmem>>, vector<16x128xf32>,
    %7 = arith.subf %1, %2 : vector<16x128xf32>
    %c0_11 = arith.constant 0 : index
    %c0_12 = arith.constant 0 : index
    %8 = vector.load %arg7[%c0_11, %c0_12] : memref<16x128xf32, #tpu.memory_space<vmem>>, vector<16x128xf32>
    tpu.vector_store %arg7[%c0_11, %c0_12], %7 {strides = array<i32>} : memref<16x128xf32, #tpu.memory_space<vmem>>, vector<16x128xf32>,
    %9 = arith.mulf %2, %3 : vector<16x128xf32>
    %c0_13 = arith.constant 0 : index
    %c0_14 = arith.constant 0 : index
    %10 = vector.load %arg8[%c0_13, %c0_14] : memref<16x128xf32, #tpu.memory_space<vmem>>, vector<16x128xf32>
    tpu.vector_store %arg8[%c0_13, %c0_14], %9 {strides = array<i32>} : memref<16x128xf32, #tpu.memory_space<vmem>>, vector<16x128xf32>,
    %cst = arith.constant 9.99999974E-6 : f32
    %11 = vector.broadcast %cst : f32 to vector<16x128xf32>
    %12 = arith.addf %4, %11 : vector<16x128xf32>
    %13 = arith.divf %3, %12 : vector<16x128xf32>
    %c0_15 = arith.constant 0 : index
    %c0_16 = arith.constant 0 : index
    %14 = vector.load %arg9[%c0_15, %c0_16] : memref<16x128xf32, #tpu.memory_space<vmem>>, vector<16x128xf32>
    tpu.vector_store %arg9[%c0_15, %c0_16], %13 {strides = array<i32>} : memref<16x128xf32, #tpu.memory_space<vmem>>, vector<16x128xf32>,
    %15 = arith.cmpf ogt, %0, %1 : vector<16x128xf32>
    %c0_17 = arith.constant 0 : index
    %c0_18 = arith.constant 0 : index
    %16 = vector.load %arg10[%c0_17, %c0_18] : memref<16x128xi32, #tpu.memory_space<vmem>>, vector<16x128xi32>
    %17 = arith.extui %15 : vector<16x128xi1> to vector<16x128xi32>
    %cst_19 = arith.constant dense<0> : vector<16x128xi32>
    %18 = arith.cmpi ne, %16, %cst_19 : vector<16x128xi32>
    tpu.vector_store %arg10[%c0_17, %c0_18], %17 {strides = array<i32>} : memref<16x128xi32, #tpu.memory_space<vmem>>, vector<16x128xi32>,
    %19 = arith.cmpf olt, %1, %2 : vector<16x128xf32>
    %c0_20 = arith.constant 0 : index
    %c0_21 = arith.constant 0 : index
    %20 = vector.load %arg11[%c0_20, %c0_21] : memref<16x128xi32, #tpu.memory_space<vmem>>, vector<16x128xi32>
    %21 = arith.extui %19 : vector<16x128xi1> to vector<16x128xi32>
    %cst_22 = arith.constant dense<0> : vector<16x128xi32>
    %22 = arith.cmpi ne, %20, %cst_22 : vector<16x128xi32>
    tpu.vector_store %arg11[%c0_20, %c0_21], %21 {strides = array<i32>} : memref<16x128xi32, #tpu.memory_space<vmem>>, vector<16x128xi32>,
    %23 = arith.cmpf oeq, %2, %3 : vector<16x128xf32>
    %c0_23 = arith.constant 0 : index
    %c0_24 = arith.constant 0 : index
    %24 = vector.load %arg12[%c0_23, %c0_24] : memref<16x128xi32, #tpu.memory_space<vmem>>, vector<16x128xi32>
    %25 = arith.extui %23 : vector<16x128xi1> to vector<16x128xi32>
    %cst_25 = arith.constant dense<0> : vector<16x128xi32>
    %26 = arith.cmpi ne, %24, %cst_25 : vector<16x128xi32>
    tpu.vector_store %arg12[%c0_23, %c0_24], %25 {strides = array<i32>} : memref<16x128xi32, #tpu.memory_space<vmem>>, vector<16x128xi32>,
    return
  }
  func.func @transform_0(%arg0: i32) -> (i32, i32) {
    %c0_i32 = arith.constant 0 : i32
    %c0_i32_0 = arith.constant 0 : i32
    return %arg0, %c0_i32 : i32, i32
  }
  func.func @transform_1(%arg0: i32) -> (i32, i32) {
    %c0_i32 = arith.constant 0 : i32
    %c0_i32_0 = arith.constant 0 : i32
    return %arg0, %c0_i32 : i32, i32
  }
  func.func @transform_2(%arg0: i32) -> (i32, i32) {
    %c0_i32 = arith.constant 0 : i32
    %c0_i32_0 = arith.constant 0 : i32
    return %arg0, %c0_i32 : i32, i32
  }
  func.func @transform_3(%arg0: i32) -> (i32, i32) {
    %c0_i32 = arith.constant 0 : i32
    %c0_i32_0 = arith.constant 0 : i32
    return %arg0, %c0_i32 : i32, i32
  }
  func.func @transform_4(%arg0: i32) -> (i32, i32) {
    %c0_i32 = arith.constant 0 : i32
    %c0_i32_0 = arith.constant 0 : i32
    return %arg0, %c0_i32 : i32, i32
  }
  func.func @transform_5(%arg0: i32) -> (i32, i32) {
    %c0_i32 = arith.constant 0 : i32
    %c0_i32_0 = arith.constant 0 : i32
    return %arg0, %c0_i32 : i32, i32
  }
  func.func @transform_6(%arg0: i32) -> (i32, i32) {
    %c0_i32 = arith.constant 0 : i32
    %c0_i32_0 = arith.constant 0 : i32
    return %arg0, %c0_i32 : i32, i32
  }
  func.func @transform_7(%arg0: i32) -> (i32, i32) {
    %c0_i32 = arith.constant 0 : i32
    %c0_i32_0 = arith.constant 0 : i32
    return %arg0, %c0_i32 : i32, i32
  }
  func.func @transform_8(%arg0: i32) -> (i32, i32) {
    %c0_i32 = arith.constant 0 : i32
    %c0_i32_0 = arith.constant 0 : i32
    return %arg0, %c0_i32 : i32, i32
  }
  func.func @transform_9(%arg0: i32) -> (i32, i32) {
    %c0_i32 = arith.constant 0 : i32
    %c0_i32_0 = arith.constant 0 : i32
    return %arg0, %c0_i32 : i32, i32
  }
  func.func @transform_10(%arg0: i32) -> (i32, i32) {
    %c0_i32 = arith.constant 0 : i32
    %c0_i32_0 = arith.constant 0 : i32
    return %arg0, %c0_i32 : i32, i32
  }
  func.func @transform_11(%arg0: i32) -> (i32, i32) {
    %c0_i32 = arith.constant 0 : i32
    %c0_i32_0 = arith.constant 0 : i32
    return %arg0, %c0_i32 : i32, i32
  }
}

module attributes {stable_mosaic.version = 11 : i64} {
  func.func @_eltwise_kernel(%arg0: i32, %arg1: memref<16x128xf32, #tpu.memory_space<vmem>>, %arg2: memref<16x128xf32, #tpu.memory_space<vmem>>, %arg3: memref<16x128xf32, #tpu.memory_space<vmem>>, %arg4: memref<16x128xf32, #tpu.memory_space<vmem>>, %arg5: memref<16x128xf32, #tpu.memory_space<vmem>>, %arg6: memref<16x128xf32, #tpu.memory_space<vmem>>, %arg7: memref<16x128xf32, #tpu.memory_space<vmem>>, %arg8: memref<16x128xf32, #tpu.memory_space<vmem>>, %arg9: memref<16x128xf32, #tpu.memory_space<vmem>>, %arg10: memref<16x128xi8, #tpu.memory_space<vmem>>, %arg11: memref<16x128xi8, #tpu.memory_space<vmem>>, %arg12: memref<16x128xi8, #tpu.memory_space<vmem>>) attributes {dimension_semantics = [#tpu.dimension_semantics<parallel>], iteration_bounds = array<i64: 1>, scalar_prefetch = 0 : i64, scratch_operands = 0 : i64, tpu.core_type = #tpu.core_type<tc>, window_params = [{transform_indices = @transform_0, window_bounds = array<i64: 16, 128>}, {transform_indices = @transform_1, window_bounds = array<i64: 16, 128>}, {transform_indices = @transform_2, window_bounds = array<i64: 16, 128>}, {transform_indices = @transform_3, window_bounds = array<i64: 16, 128>}, {transform_indices = @transform_4, window_bounds = array<i64: 16, 128>}, {transform_indices = @transform_5, window_bounds = array<i64: 16, 128>}, {transform_indices = @transform_6, window_bounds = array<i64: 16, 128>}, {transform_indices = @transform_7, window_bounds = array<i64: 16, 128>}, {transform_indices = @transform_8, window_bounds = array<i64: 16, 128>}, {transform_indices = @transform_9, window_bounds = array<i64: 16, 128>}, {transform_indices = @transform_10, window_bounds = array<i64: 16, 128>}, {transform_indices = @transform_11, window_bounds = array<i64: 16, 128>}]} {
    %c0 = arith.constant 0 : index
    %c0_0 = arith.constant 0 : index
    %0 = vector.load %arg1[%c0, %c0_0] : memref<16x128xf32, #tpu.memory_space<vmem>>, vector<16x128xf32>
    %c0_1 = arith.constant 0 : index
    %c0_2 = arith.constant 0 : index
    %1 = vector.load %arg2[%c0_1, %c0_2] : memref<16x128xf32, #tpu.memory_space<vmem>>, vector<16x128xf32>
    %c0_3 = arith.constant 0 : index
    %c0_4 = arith.constant 0 : index
    %2 = vector.load %arg3[%c0_3, %c0_4] : memref<16x128xf32, #tpu.memory_space<vmem>>, vector<16x128xf32>
    %c0_5 = arith.constant 0 : index
    %c0_6 = arith.constant 0 : index
    %3 = vector.load %arg4[%c0_5, %c0_6] : memref<16x128xf32, #tpu.memory_space<vmem>>, vector<16x128xf32>
    %c0_7 = arith.constant 0 : index
    %c0_8 = arith.constant 0 : index
    %4 = vector.load %arg5[%c0_7, %c0_8] : memref<16x128xf32, #tpu.memory_space<vmem>>, vector<16x128xf32>
    %5 = arith.addf %0, %1 : vector<16x128xf32>
    %c0_9 = arith.constant 0 : index
    %c0_10 = arith.constant 0 : index
    %6 = vector.load %arg6[%c0_9, %c0_10] : memref<16x128xf32, #tpu.memory_space<vmem>>, vector<16x128xf32>
    tpu.vector_store %arg6[%c0_9, %c0_10], %5 {strides = array<i32>} : memref<16x128xf32, #tpu.memory_space<vmem>>, vector<16x128xf32>,
    %7 = arith.subf %1, %2 : vector<16x128xf32>
    %c0_11 = arith.constant 0 : index
    %c0_12 = arith.constant 0 : index
    %8 = vector.load %arg7[%c0_11, %c0_12] : memref<16x128xf32, #tpu.memory_space<vmem>>, vector<16x128xf32>
    tpu.vector_store %arg7[%c0_11, %c0_12], %7 {strides = array<i32>} : memref<16x128xf32, #tpu.memory_space<vmem>>, vector<16x128xf32>,
    %9 = arith.mulf %2, %3 : vector<16x128xf32>
    %c0_13 = arith.constant 0 : index
    %c0_14 = arith.constant 0 : index
    %10 = vector.load %arg8[%c0_13, %c0_14] : memref<16x128xf32, #tpu.memory_space<vmem>>, vector<16x128xf32>
    tpu.vector_store %arg8[%c0_13, %c0_14], %9 {strides = array<i32>} : memref<16x128xf32, #tpu.memory_space<vmem>>, vector<16x128xf32>,
    %cst = arith.constant 9.99999974E-6 : f32
    %11 = vector.broadcast %cst : f32 to vector<16x128xf32>
    %12 = arith.addf %4, %11 : vector<16x128xf32>
    %13 = arith.divf %3, %12 : vector<16x128xf32>
    %c0_15 = arith.constant 0 : index
    %c0_16 = arith.constant 0 : index
    %14 = vector.load %arg9[%c0_15, %c0_16] : memref<16x128xf32, #tpu.memory_space<vmem>>, vector<16x128xf32>
    tpu.vector_store %arg9[%c0_15, %c0_16], %13 {strides = array<i32>} : memref<16x128xf32, #tpu.memory_space<vmem>>, vector<16x128xf32>,
    %15 = arith.cmpf ogt, %0, %1 : vector<16x128xf32>
    %16 = arith.extui %15 : vector<16x128xi1> to vector<16x128xi8>
    %c0_17 = arith.constant 0 : index
    %c0_18 = arith.constant 0 : index
    %17 = vector.load %arg10[%c0_17, %c0_18] : memref<16x128xi8, #tpu.memory_space<vmem>>, vector<16x128xi8>
    tpu.vector_store %arg10[%c0_17, %c0_18], %16 {strides = array<i32>} : memref<16x128xi8, #tpu.memory_space<vmem>>, vector<16x128xi8>,
    %18 = arith.cmpf olt, %1, %2 : vector<16x128xf32>
    %19 = arith.extui %18 : vector<16x128xi1> to vector<16x128xi8>
    %c0_19 = arith.constant 0 : index
    %c0_20 = arith.constant 0 : index
    %20 = vector.load %arg11[%c0_19, %c0_20] : memref<16x128xi8, #tpu.memory_space<vmem>>, vector<16x128xi8>
    tpu.vector_store %arg11[%c0_19, %c0_20], %19 {strides = array<i32>} : memref<16x128xi8, #tpu.memory_space<vmem>>, vector<16x128xi8>,
    %21 = arith.cmpf oeq, %2, %3 : vector<16x128xf32>
    %22 = arith.extui %21 : vector<16x128xi1> to vector<16x128xi8>
    %c0_21 = arith.constant 0 : index
    %c0_22 = arith.constant 0 : index
    %23 = vector.load %arg12[%c0_21, %c0_22] : memref<16x128xi8, #tpu.memory_space<vmem>>, vector<16x128xi8>
    tpu.vector_store %arg12[%c0_21, %c0_22], %22 {strides = array<i32>} : memref<16x128xi8, #tpu.memory_space<vmem>>, vector<16x128xi8>,
    return
  }
  func.func @transform_0(%arg0: i32) -> (i32, i32) {
    %c0_i32 = arith.constant 0 : i32
    %c0_i32_0 = arith.constant 0 : i32
    return %arg0, %c0_i32 : i32, i32
  }
  func.func @transform_1(%arg0: i32) -> (i32, i32) {
    %c0_i32 = arith.constant 0 : i32
    %c0_i32_0 = arith.constant 0 : i32
    return %arg0, %c0_i32 : i32, i32
  }
  func.func @transform_2(%arg0: i32) -> (i32, i32) {
    %c0_i32 = arith.constant 0 : i32
    %c0_i32_0 = arith.constant 0 : i32
    return %arg0, %c0_i32 : i32, i32
  }
  func.func @transform_3(%arg0: i32) -> (i32, i32) {
    %c0_i32 = arith.constant 0 : i32
    %c0_i32_0 = arith.constant 0 : i32
    return %arg0, %c0_i32 : i32, i32
  }
  func.func @transform_4(%arg0: i32) -> (i32, i32) {
    %c0_i32 = arith.constant 0 : i32
    %c0_i32_0 = arith.constant 0 : i32
    return %arg0, %c0_i32 : i32, i32
  }
  func.func @transform_5(%arg0: i32) -> (i32, i32) {
    %c0_i32 = arith.constant 0 : i32
    %c0_i32_0 = arith.constant 0 : i32
    return %arg0, %c0_i32 : i32, i32
  }
  func.func @transform_6(%arg0: i32) -> (i32, i32) {
    %c0_i32 = arith.constant 0 : i32
    %c0_i32_0 = arith.constant 0 : i32
    return %arg0, %c0_i32 : i32, i32
  }
  func.func @transform_7(%arg0: i32) -> (i32, i32) {
    %c0_i32 = arith.constant 0 : i32
    %c0_i32_0 = arith.constant 0 : i32
    return %arg0, %c0_i32 : i32, i32
  }
  func.func @transform_8(%arg0: i32) -> (i32, i32) {
    %c0_i32 = arith.constant 0 : i32
    %c0_i32_0 = arith.constant 0 : i32
    return %arg0, %c0_i32 : i32, i32
  }
  func.func @transform_9(%arg0: i32) -> (i32, i32) {
    %c0_i32 = arith.constant 0 : i32
    %c0_i32_0 = arith.constant 0 : i32
    return %arg0, %c0_i32 : i32, i32
  }
  func.func @transform_10(%arg0: i32) -> (i32, i32) {
    %c0_i32 = arith.constant 0 : i32
    %c0_i32_0 = arith.constant 0 : i32
    return %arg0, %c0_i32 : i32, i32
  }
  func.func @transform_11(%arg0: i32) -> (i32, i32) {
    %c0_i32 = arith.constant 0 : i32
    %c0_i32_0 = arith.constant 0 : i32
    return %arg0, %c0_i32 : i32, i32
  }
}

</mosaic_0001>

<bundles_post_ra>
// kernel: tpu_custom_call.1
= control target key start
LH: loop header
LB: loop body
LE: loop exit
PB: predicated region body
PF: predicated region fallthrough
CT: control target
= control target key end

     0   :  { %17 = vsyncpa [#allocation3], 0  ;;  %s608_s0 = inlined_call_operand.hbm [shape: f32[16,128], index: 0, kind: input, shape index: {}]   ;;  %s609_s1 = inlined_call_operand.hbm [shape: f32[16,128], index: 1, kind: input, shape index: {}]   ;;  %s610_s2 = inlined_call_operand.hbm [shape: f32[16,128], index: 2, kind: input, shape index: {}]   ;;  %s611_s3 = inlined_call_operand.hbm [shape: f32[16,128], index: 3, kind: input, shape index: {}]   ;;  %s612_s4 = inlined_call_operand.hbm [shape: f32[16,128], index: 4, kind: input, shape index: {}]   ;;  %s613_s5 = inlined_call_operand.hbm [shape: f32[16,128], index: 5, kind: output, shape index: {0}]   ;;  %s614_s6 = inlined_call_operand.hbm [shape: f32[16,128], index: 6, kind: output, shape index: {1}]   ;;  %s615_s7 = inlined_call_operand.hbm [shape: f32[16,128], index: 7, kind: output, shape index: {2}]   ;;  %s616_s8 = inlined_call_operand.hbm [shape: f32[16,128], index: 8, kind: output, shape index: {3}]   ;;  %s617_s9 = inlined_call_operand.vmem [shape: s32[16,128], index: 9, kind: output, shape index: {4}]   ;;  %s618_s10 = inlined_call_operand.vmem [shape: s32[16,128], index: 10, kind: output, shape index: {5}]   ;;  %s619_s11 = inlined_call_operand.vmem [shape: s32[16,128], index: 11, kind: output, shape index: {6}]  }
   0x1   :  { %18 = vsyncpa [#allocation6], 0 }
   0x2   :  { %19 = vsyncpa [#allocation9], 0 }
   0x3   :  { %20 = vsyncpa [#allocation4], 0 }
   0x4   :  { %21 = vsyncpa [#allocation13], 0 }
   0x5   :  { %22 = vsyncpa [#allocation16], 0  ;;  %s432_s17 = smov [#allocation5]   ;;  %s433_s19 = smov [#allocation8]  }
   0x6   :  { %s40_s18 = sshll.u32 %s432_s17, 4  ;;  %s64_s20 = sshll.u32 %s433_s19, 4  ;;  %s41_s18 = int_to_ptr.vmem [resolvable:$true] %s40_s18  ;;  %s65_s20 = int_to_ptr.vmem [resolvable:$true] %s64_s20 }
   0x7   :  { %s248_s21 = scalar_lea.vmem %s41_s18, 256  ;;  %p253_p1 = scmp.lt.s32.totalorder %s41_s18, %s41_s18 }
   0x8   :  { %p249_p0 = scmp.ne.s32.totalorder %s41_s18, %s248_s21  ;;  %p254_p2 = scmp.lt.s32.totalorder %s248_s21, %s248_s21 }
   0xa   :  { %p255_p3 = por %p254_p2, %p253_p1 }
   0xc   :  { %p256_p4 = pnand %p255_p3, %p249_p0 }
   0xe   :  { %259 = shalt.err (!%p256_p4)
}
   0xf   :  { %s434_s22 = smov 128   ;;  %s435_s23 = smov 8  }
  0x10   :  { %46 = dma.hbm_to_vmem [thread:$0]  %s609_s1, 256, %s41_s18, [#allocation6], %s434_s22, %s434_s22, %s435_s23  }
  0x11   :  { %s268_s26 = scalar_lea.vmem %s65_s20, 256  ;;  %p273_p6 = scmp.lt.s32.totalorder %s65_s20, %s65_s20 }
  0x12   :  { %p269_p5 = scmp.ne.s32.totalorder %s65_s20, %s268_s26  ;;  %p274_p7 = scmp.lt.s32.totalorder %s268_s26, %s268_s26 }
  0x14   :  { %p275_p8 = por %p274_p7, %p273_p6 }
  0x16   :  { %p276_p9 = pnand %p275_p8, %p269_p5 }
  0x18   :  { %279 = shalt.err (!%p276_p9)
}
  0x19   :  { %70 = dma.hbm_to_vmem [thread:$0]  %s611_s3, 256, %s65_s20, [#allocation9], %s434_s22, %s434_s22, %s435_s23  }
  0x1a   :  { %s436_s29 = smov [#allocation2]   ;;  %s437_s12 = smov [#allocation7]  }
  0x1b   :  { %s28_s30 = sshll.u32 %s436_s29, 4  ;;  %s52_s13 = sshll.u32 %s437_s12, 4  ;;  %s29_s30 = int_to_ptr.vmem [resolvable:$true] %s28_s30  ;;  %s53_s13 = int_to_ptr.vmem [resolvable:$true] %s52_s13 }
  0x1c   :  { %s288_s1 = scalar_lea.vmem %s29_s30, 256  ;;  %p293_p11 = scmp.lt.s32.totalorder %s29_s30, %s29_s30 }
  0x1d   :  { %p289_p10 = scmp.ne.s32.totalorder %s29_s30, %s288_s1  ;;  %p294_p12 = scmp.lt.s32.totalorder %s288_s1, %s288_s1 }
  0x1f   :  { %p295_p13 = por %p294_p12, %p293_p11 }
  0x21   :  { %p296_p0 = pnand %p295_p13, %p289_p10 }
  0x23   :  { %299 = shalt.err (!%p296_p0)
}
  0x24   :  { %34 = dma.hbm_to_vmem [thread:$0]  %s608_s0, 256, %s29_s30, [#allocation3], %s434_s22, %s434_s22, %s435_s23  }
  0x25   :  { %s308_s3 = scalar_lea.vmem %s53_s13, 256  ;;  %p313_p2 = scmp.lt.s32.totalorder %s53_s13, %s53_s13 }
  0x26   :  { %p309_p1 = scmp.ne.s32.totalorder %s53_s13, %s308_s3  ;;  %p314_p3 = scmp.lt.s32.totalorder %s308_s3, %s308_s3 }
  0x28   :  { %p315_p4 = por %p314_p3, %p313_p2 }
  0x2a   :  { %p316_p5 = pnand %p315_p4, %p309_p1 }
  0x2c   :  { %319 = shalt.err (!%p316_p5)
}
  0x2d   :  { %58 = dma.hbm_to_vmem [thread:$0]  %s610_s2, 256, %s53_s13, [#allocation6], %s434_s22, %s434_s22, %s435_s23  }
  0x2e   :  { %s438_s18 = smov [#allocation10]  }
  0x2f   :  { %s76_s19 = sshll.u32 %s438_s18, 4  ;;  %s77_s19 = int_to_ptr.vmem [resolvable:$true] %s76_s19 }
  0x30   :  { %s328_s20 = scalar_lea.vmem %s77_s19, 256  ;;  %p333_p7 = scmp.lt.s32.totalorder %s77_s19, %s77_s19 }
  0x31   :  { %p329_p6 = scmp.ne.s32.totalorder %s77_s19, %s328_s20  ;;  %p334_p8 = scmp.lt.s32.totalorder %s328_s20, %s328_s20 }
  0x33   :  { %p335_p9 = por %p334_p8, %p333_p7 }
  0x35   :  { %p336_p10 = pnand %p335_p9, %p329_p6 }
  0x37   :  { %339 = shalt.err (!%p336_p10)
}
  0x38   :  { %82 = dma.hbm_to_vmem [thread:$0]  %s612_s4, 256, %s77_s19, [#allocation9], %s434_s22, %s434_s22, %s435_s23  }
  0x39   :  { %420 = dma.done.wait [#allocation3], 256  }
  0x3a   :  { %421 = vsyncadd [#allocation3], 4294967040 }
  0x3b   :  { %422 = dma.done.wait [#allocation6], 512  }
  0x3c   :  { %423 = vsyncadd [#allocation6], 4294966784 }
  0x3d   :  { %424 = dma.done.wait [#allocation9], 512  }
  0x3e   :  { %425 = vsyncadd [#allocation9], 4294966784  ;;  %s439_s2 = smov [#allocation12]   ;;  %v100_v0 = vld [vmem:[#allocation5] sm:$0xff]  ;;  %v102_v1 = vld [vmem:[#allocation7] sm:$0xff]  ;;  %s440_s25 = smov [#allocation11]  }
  0x3f   :  { %s163_s24 = sshll.u32 %s439_s2, 4  ;;  %v101_v2 = vld [vmem:[#allocation5 + $0x8] sm:$0xff]  ;;  %s151_s26 = sshll.u32 %s440_s25, 4  ;;  %v112_v3 = vsub.f32 %v100_v0, %v102_v1  ;;  %v103_v4 = vld [vmem:[#allocation7 + $0x8] sm:$0xff]  ;;  %v98_v5 = vld [vmem:[#allocation2] sm:$0xff]  ;;  %vm134_vm0 = vcmp.lt.f32.partialorder %v100_v0, %v102_v1  ;;  %v442_v17 = vmov 0   ;;  %s538_s24 = int_to_ptr.vmem [resolvable:$true] %s163_s24  ;;  %s542_s26 = int_to_ptr.vmem [resolvable:$true] %s151_s26 }
  0x40   :  { %v99_v6 = vld [vmem:[#allocation2 + $0x8] sm:$0xff]  ;;  %s441_s27 = smov [#allocation14]   ;;  %v113_v7 = vsub.f32 %v101_v2, %v103_v4  ;;  %v108_v8 = vadd.f32 %v100_v0, %v98_v5  ;;  %v534_v10 = vld [vmem:[#allocation8] sm:$0xff]  ;;  %v536_v11 = vld [vmem:[#allocation8 + $0x8] sm:$0xff]  ;;  %vm128_vm1 = vcmp.gt.f32.partialorder %v98_v5, %v100_v0  ;;  %v136_v20 = vsel %vm134_vm0, 1, %v442_v17  ;;  %s340_s30 = scalar_lea.vmem %s538_s24, 256 }
  0x41   :  { %s175_s4 = sshll.u32 %s441_s27, 4  ;;  %v109_v9 = vadd.f32 %v101_v2, %v99_v6  ;;  %v106_v12 = vld [vmem:[#allocation10] sm:$0xff]  ;;  %114 = vst [vmem:[#allocation12] sm:$0xff] %v112_v3  ;;  %v116_v13 = vmul.f32 %v534_v10, %v102_v1  ;;  %v117_v14 = vmul.f32 %v536_v11, %v103_v4  ;;  %v107_v16 = vld [vmem:[#allocation10 + $0x8] sm:$0xff]  ;;  %v130_v18 = vsel %vm128_vm1, 1, %v442_v17  ;;  %p341_p11 = scmp.ne.s32.totalorder %s538_s24, %s340_s30  ;;  %s548_s4 = int_to_ptr.vmem [resolvable:$true] %s175_s4 }
  0x42   :  { %v120_v15 = vadd.f32 1e-05, %v106_v12  ;;  %115 = vst [vmem:[#allocation12 + $0x8] sm:$0xff] %v113_v7  ;;  %110 = vst [vmem:[#allocation11] sm:$0xff] %v108_v8  ;;  %v121_v19 = vadd.f32 1e-05, %v107_v16  ;;  %vm129_vm2 = vcmp.gt.f32.partialorder %v99_v6, %v101_v2  ;;  %vm135_vm3 = vcmp.lt.f32.partialorder %v101_v2, %v103_v4  ;;  %p345_p12 = scmp.lt.s32.totalorder %s538_s24, %s538_s24  ;;  %p346_p13 = scmp.lt.s32.totalorder %s340_s30, %s340_s30 }
  0x43   :  { %111 = vst [vmem:[#allocation11 + $0x8] sm:$0xff] %v109_v9  ;;  %132 = vst [vmem:[%s617_s9] sm:$0xff] %v130_v18 }
  0x44   :  { %118 = vst [vmem:[#allocation14] sm:$0xff] %v116_v13  ;;  %119 = vst [vmem:[#allocation14 + $0x8] sm:$0xff] %v117_v14  ;;  %236 = vrcp.f32 %v120_v15  ;;  %p347_p0 = por %p346_p13, %p345_p12 }
  0x46   :  { %p348_p1 = pnand %p347_p0, %p341_p11 }
  0x48   :  { %351 = shalt.err (!%p348_p1)
}
  0x49   :  { %169 = dma.vmem_to_hbm [thread:$0]  %s538_s24, 256, %s614_s6, [#allocation13], %s434_s22, %s434_s22, %s435_s23   ;;  %v131_v21 = vsel %vm129_vm2, 1, %v442_v17  ;;  %v137_v22 = vsel %vm135_vm3, 1, %v442_v17  ;;  %vm140_vm4 = vcmp.eq.f32.partialorder %v102_v1, %v534_v10  ;;  %238 = vrcp.f32 %v121_v19 }
  0x4a   :  { %138 = vst [vmem:[%s618_s10] sm:$0xff] %v136_v20  ;;  %133 = vst [vmem:[%s617_s9 + $0x8] sm:$0xff] %v131_v21  ;;  %v142_v23 = vsel %vm140_vm4, 1, %v442_v17  ;;  %vm141_vm5 = vcmp.eq.f32.partialorder %v103_v4, %v536_v11  ;;  %s360_s6 = scalar_lea.vmem %s542_s26, 256  ;;  %p365_p3 = scmp.lt.s32.totalorder %s542_s26, %s542_s26 }
  0x4b   :  { %139 = vst [vmem:[%s618_s10 + $0x8] sm:$0xff] %v137_v22  ;;  %p361_p2 = scmp.ne.s32.totalorder %s542_s26, %s360_s6  ;;  %p366_p4 = scmp.lt.s32.totalorder %s360_s6, %s360_s6 }
  0x4d   :  { %p367_p5 = por %p366_p4, %p365_p3 }
  0x4f   :  { %p368_p6 = pnand %p367_p5, %p361_p2 }
  0x51   :  { %371 = shalt.err (!%p368_p6)
}
  0x52   :  { %157 = dma.vmem_to_hbm [thread:$0]  %s542_s26, 256, %s613_s5, [#allocation4], %s434_s22, %s434_s22, %s435_s23   ;;  %v143_v24 = vsel %vm141_vm5, 1, %v442_v17 }
  0x53   :  { %144 = vst [vmem:[%s619_s11] sm:$0xff] %v142_v23  ;;  %s380_s20 = scalar_lea.vmem %s548_s4, 256  ;;  %p385_p8 = scmp.lt.s32.totalorder %s548_s4, %s548_s4 }
  0x54   :  { %p381_p7 = scmp.ne.s32.totalorder %s548_s4, %s380_s20  ;;  %p386_p9 = scmp.lt.s32.totalorder %s380_s20, %s380_s20 }
  0x56   :  { %p387_p10 = por %p386_p9, %p385_p8 }
  0x58   :  { %p388_p11 = pnand %p387_p10, %p381_p7 }
  0x5a   :  { %391 = shalt.err (!%p388_p11)
}
  0x5b   :  { %181 = dma.vmem_to_hbm [thread:$0]  %s548_s4, 256, %s615_s7, [#allocation13], %s434_s22, %s434_s22, %s435_s23   ;;  %v237_v25 = vpop.eup %236 }
  0x5c   :  { %145 = vst [vmem:[%s619_s11 + $0x8] sm:$0xff] %v143_v24  ;;  %s443_s24 = smov [#allocation15]   ;;  %v239_v26 = vpop.eup %238  ;;  %v123_v27 = vmul.f32 %v237_v25, %v534_v10 }
  0x5d   :  { %s187_s25 = sshll.u32 %s443_s24, 4  ;;  %v125_v28 = vmul.f32 %v239_v26, %v536_v11  ;;  %s188_s25 = int_to_ptr.vmem [resolvable:$true] %s187_s25 }
  0x5e   :  { %126 = vst [vmem:[#allocation15] sm:$0xff] %v123_v27  ;;  %s400_s26 = scalar_lea.vmem %s188_s25, 256  ;;  %p405_p13 = scmp.lt.s32.totalorder %s188_s25, %s188_s25 }
  0x5f   :  { %127 = vst [vmem:[#allocation15 + $0x8] sm:$0xff] %v125_v28  ;;  %p401_p12 = scmp.ne.s32.totalorder %s188_s25, %s400_s26  ;;  %p406_p0 = scmp.lt.s32.totalorder %s400_s26, %s400_s26 }
  0x61   :  { %p407_p1 = por %p406_p0, %p405_p13 }
  0x63   :  { %p408_p2 = pnand %p407_p1, %p401_p12 }
  0x65   :  { %411 = shalt.err (!%p408_p2)
}
  0x66   :  { %193 = dma.vmem_to_hbm [thread:$0]  %s188_s25, 256, %s616_s8, [#allocation16], %s434_s22, %s434_s22, %s435_s23  }
  0x67   :  { %426 = dma.done.wait [#allocation4], 256  }
  0x68   :  { %427 = vsyncadd [#allocation4], 4294967040 }
  0x69   :  { %428 = dma.done.wait [#allocation13], 512  }
  0x6a   :  { %429 = vsyncadd [#allocation13], 4294966784 }
  0x6b   :  { %430 = dma.done.wait [#allocation16], 256  }
  0x6c   :  { %431 = vsyncadd [#allocation16], 4294967040 }
  0x6d   :  { %218 = vsyncpa [#allocation3], 1 }
  0x6e   :  { %219 = vsyncpa [#allocation6], 1 }
  0x6f   :  { %220 = vsyncpa [#allocation9], 1 }
  0x70   :  { %221 = vsyncpa [#allocation4], 1 }
  0x71   :  { %222 = vsyncpa [#allocation13], 1 }
  0x72   :  { %223 = vsyncpa [#allocation16], 1 }

// kernel: tpu_custom_call.1
= control target key start
LH: loop header
LB: loop body
LE: loop exit
PB: predicated region body
PF: predicated region fallthrough
CT: control target
= control target key end

     0   :  { %17 = vsyncpa [#allocation3], 0  ;;  %s768_s0 = inlined_call_operand.hbm [shape: f32[16,128], index: 0, kind: input, shape index: {}]   ;;  %s769_s1 = inlined_call_operand.hbm [shape: f32[16,128], index: 1, kind: input, shape index: {}]   ;;  %s770_s2 = inlined_call_operand.hbm [shape: f32[16,128], index: 2, kind: input, shape index: {}]   ;;  %s771_s3 = inlined_call_operand.hbm [shape: f32[16,128], index: 3, kind: input, shape index: {}]   ;;  %s772_s4 = inlined_call_operand.hbm [shape: f32[16,128], index: 4, kind: input, shape index: {}]   ;;  %s773_s5 = inlined_call_operand.hbm [shape: f32[16,128], index: 5, kind: output, shape index: {0}]   ;;  %s774_s6 = inlined_call_operand.hbm [shape: f32[16,128], index: 6, kind: output, shape index: {1}]   ;;  %s775_s7 = inlined_call_operand.hbm [shape: f32[16,128], index: 7, kind: output, shape index: {2}]   ;;  %s776_s8 = inlined_call_operand.hbm [shape: f32[16,128], index: 8, kind: output, shape index: {3}]   ;;  %s777_s9 = inlined_call_operand.hbm [shape: u8[16,128], index: 9, kind: output, shape index: {4}]   ;;  %s778_s10 = inlined_call_operand.hbm [shape: u8[16,128], index: 10, kind: output, shape index: {5}]   ;;  %s779_s11 = inlined_call_operand.hbm [shape: u8[16,128], index: 11, kind: output, shape index: {6}]  }
   0x1   :  { %18 = vsyncpa [#allocation6], 0 }
   0x2   :  { %19 = vsyncpa [#allocation9], 0 }
   0x3   :  { %20 = vsyncpa [#allocation4], 0 }
   0x4   :  { %21 = vsyncpa [#allocation13], 0 }
   0x5   :  { %22 = vsyncpa [#allocation16], 0 }
   0x6   :  { %23 = vsyncpa [#allocation19], 0  ;;  %s557_s17 = smov [#allocation5]   ;;  %s558_s19 = smov [#allocation8]  }
   0x7   :  { %s41_s18 = sshll.u32 %s557_s17, 4  ;;  %s65_s20 = sshll.u32 %s558_s19, 4  ;;  %s42_s18 = int_to_ptr.vmem [resolvable:$true] %s41_s18  ;;  %s66_s20 = int_to_ptr.vmem [resolvable:$true] %s65_s20 }
   0x8   :  { %s311_s21 = scalar_lea.vmem %s42_s18, 256  ;;  %p316_p1 = scmp.lt.s32.totalorder %s42_s18, %s42_s18 }
   0x9   :  { %p312_p0 = scmp.ne.s32.totalorder %s42_s18, %s311_s21  ;;  %p317_p2 = scmp.lt.s32.totalorder %s311_s21, %s311_s21 }
   0xb   :  { %p318_p3 = por %p317_p2, %p316_p1 }
   0xd   :  { %p319_p4 = pnand %p318_p3, %p312_p0 }
   0xf   :  { %322 = shalt.err (!%p319_p4)
}
  0x10   :  { %s559_s22 = smov 128   ;;  %s560_s23 = smov 8  }
  0x11   :  { %47 = dma.hbm_to_vmem [thread:$0]  %s769_s1, 256, %s42_s18, [#allocation6], %s559_s22, %s559_s22, %s560_s23  }
  0x12   :  { %s331_s26 = scalar_lea.vmem %s66_s20, 256  ;;  %p336_p6 = scmp.lt.s32.totalorder %s66_s20, %s66_s20 }
  0x13   :  { %p332_p5 = scmp.ne.s32.totalorder %s66_s20, %s331_s26  ;;  %p337_p7 = scmp.lt.s32.totalorder %s331_s26, %s331_s26 }
  0x15   :  { %p338_p8 = por %p337_p7, %p336_p6 }
  0x17   :  { %p339_p9 = pnand %p338_p8, %p332_p5 }
  0x19   :  { %342 = shalt.err (!%p339_p9)
}
  0x1a   :  { %71 = dma.hbm_to_vmem [thread:$0]  %s771_s3, 256, %s66_s20, [#allocation9], %s559_s22, %s559_s22, %s560_s23  }
  0x1b   :  { %s561_s29 = smov [#allocation2]   ;;  %s562_s12 = smov [#allocation7]  }
  0x1c   :  { %s29_s30 = sshll.u32 %s561_s29, 4  ;;  %s53_s13 = sshll.u32 %s562_s12, 4  ;;  %s30_s30 = int_to_ptr.vmem [resolvable:$true] %s29_s30  ;;  %s54_s13 = int_to_ptr.vmem [resolvable:$true] %s53_s13 }
  0x1d   :  { %s351_s1 = scalar_lea.vmem %s30_s30, 256  ;;  %p356_p11 = scmp.lt.s32.totalorder %s30_s30, %s30_s30 }
  0x1e   :  { %p352_p10 = scmp.ne.s32.totalorder %s30_s30, %s351_s1  ;;  %p357_p12 = scmp.lt.s32.totalorder %s351_s1, %s351_s1 }
  0x20   :  { %p358_p13 = por %p357_p12, %p356_p11 }
  0x22   :  { %p359_p0 = pnand %p358_p13, %p352_p10 }
  0x24   :  { %362 = shalt.err (!%p359_p0)
}
  0x25   :  { %35 = dma.hbm_to_vmem [thread:$0]  %s768_s0, 256, %s30_s30, [#allocation3], %s559_s22, %s559_s22, %s560_s23  }
  0x26   :  { %s371_s3 = scalar_lea.vmem %s54_s13, 256  ;;  %p376_p2 = scmp.lt.s32.totalorder %s54_s13, %s54_s13 }
  0x27   :  { %p372_p1 = scmp.ne.s32.totalorder %s54_s13, %s371_s3  ;;  %p377_p3 = scmp.lt.s32.totalorder %s371_s3, %s371_s3 }
  0x29   :  { %p378_p4 = por %p377_p3, %p376_p2 }
  0x2b   :  { %p379_p5 = pnand %p378_p4, %p372_p1 }
  0x2d   :  { %382 = shalt.err (!%p379_p5)
}
  0x2e   :  { %59 = dma.hbm_to_vmem [thread:$0]  %s770_s2, 256, %s54_s13, [#allocation6], %s559_s22, %s559_s22, %s560_s23  }
  0x2f   :  { %s563_s18 = smov [#allocation10]  }
  0x30   :  { %s77_s19 = sshll.u32 %s563_s18, 4  ;;  %s78_s19 = int_to_ptr.vmem [resolvable:$true] %s77_s19 }
  0x31   :  { %s391_s20 = scalar_lea.vmem %s78_s19, 256  ;;  %p396_p7 = scmp.lt.s32.totalorder %s78_s19, %s78_s19 }
  0x32   :  { %p392_p6 = scmp.ne.s32.totalorder %s78_s19, %s391_s20  ;;  %p397_p8 = scmp.lt.s32.totalorder %s391_s20, %s391_s20 }
  0x34   :  { %p398_p9 = por %p397_p8, %p396_p7 }
  0x36   :  { %p399_p10 = pnand %p398_p9, %p392_p6 }
  0x38   :  { %402 = shalt.err (!%p399_p10)
}
  0x39   :  { %83 = dma.hbm_to_vmem [thread:$0]  %s772_s4, 256, %s78_s19, [#allocation9], %s559_s22, %s559_s22, %s560_s23  }
  0x3a   :  { %543 = dma.done.wait [#allocation3], 256  }
  0x3b   :  { %544 = vsyncadd [#allocation3], 4294967040 }
  0x3c   :  { %545 = dma.done.wait [#allocation6], 512  }
  0x3d   :  { %546 = vsyncadd [#allocation6], 4294966784 }
  0x3e   :  { %547 = dma.done.wait [#allocation9], 512  }
  0x3f   :  { %548 = vsyncadd [#allocation9], 4294966784  ;;  %s564_s2 = smov [#allocation12]   ;;  %v103_v0 = vld [vmem:[#allocation5] sm:$0xff]  ;;  %v664_v1 = vld [vmem:[#allocation7] sm:$0xff]  ;;  %s565_s4 = smov [#allocation11]  }
  0x40   :  { %s187_s24 = sshll.u32 %s564_s2, 4  ;;  %v104_v2 = vld [vmem:[#allocation5 + $0x8] sm:$0xff]  ;;  %v115_v3 = vsub.f32 %v103_v0, %v664_v1  ;;  %v106_v4 = vld [vmem:[#allocation7 + $0x8] sm:$0xff]  ;;  %v667_v5 = vld [vmem:[#allocation8] sm:$0xff]  ;;  %vm144_vm0 = vcmp.lt.f32.partialorder %v103_v0, %v664_v1  ;;  %s175_s25 = sshll.u32 %s565_s4, 4  ;;  %v568_v19 = vmov 0   ;;  %s674_s24 = int_to_ptr.vmem [resolvable:$true] %s187_s24  ;;  %s692_s25 = int_to_ptr.vmem [resolvable:$true] %s175_s25 }
  0x41   :  { %v109_v6 = vld [vmem:[#allocation10] sm:$0xff]  ;;  %s566_s26 = smov [#allocation14]   ;;  %v116_v7 = vsub.f32 %v104_v2, %v106_v4  ;;  %v670_v9 = vld [vmem:[#allocation8 + $0x8] sm:$0xff]  ;;  %v110_v10 = vld [vmem:[#allocation10 + $0x8] sm:$0xff]  ;;  %vm145_vm1 = vcmp.lt.f32.partialorder %v104_v2, %v106_v4  ;;  %v119_v12 = vmul.f32 %v667_v5, %v664_v1  ;;  %vm157_vm6 = vcmp.eq.f32.partialorder %v664_v1, %v667_v5  ;;  %s567_s28 = smov [#allocation18]  }
  0x42   :  { %s199_s27 = sshll.u32 %s566_s26, 4  ;;  %v123_v8 = vadd.f32 1e-05, %v109_v6  ;;  %v101_v11 = vld [vmem:[#allocation2] sm:$0xff]  ;;  %117 = vst [vmem:[#allocation12] sm:$0xff] %v115_v3  ;;  %vm678_vm2 = vmpackc.low %vm145_vm1, %vm144_vm0  ;;  %v102_v16 = vld [vmem:[#allocation2 + $0x8] sm:$0xff]  ;;  %v120_v17 = vmul.f32 %v670_v9, %v106_v4  ;;  %vm158_vm8 = vcmp.eq.f32.partialorder %v106_v4, %v670_v9  ;;  %p408_p12 = scmp.lt.s32.totalorder %s674_s24, %s674_s24  ;;  %s683_s27 = int_to_ptr.vmem [resolvable:$true] %s199_s27 }
  0x43   :  { %v124_v13 = vadd.f32 1e-05, %v110_v10  ;;  %v111_v15 = vadd.f32 %v103_v0, %v101_v11  ;;  %vm131_vm3 = vcmp.gt.f32.partialorder %v101_v11, %v103_v0  ;;  %118 = vst [vmem:[#allocation12 + $0x8] sm:$0xff] %v116_v7  ;;  %vm147_vm4 = vmpackc.even %vm678_vm2, %vm678_vm2  ;;  %v112_v18 = vadd.f32 %v104_v2, %v102_v16  ;;  %s690_s29 = sshll.u32 %s567_s28, 4  ;;  %s403_s30 = scalar_lea.vmem %s674_s24, 256  ;;  %s236_s29 = int_to_ptr.vmem [resolvable:$true] %s690_s29 }
  0x44   :  { %299 = vrcp.f32 %v123_v8  ;;  %vm132_vm5 = vcmp.gt.f32.partialorder %v102_v16, %v104_v2  ;;  %121 = vst [vmem:[#allocation14] sm:$0xff] %v119_v12  ;;  %v148_v20 = vsel %vm147_vm4, 16843009, %v568_v19  ;;  %122 = vst [vmem:[#allocation14 + $0x8] sm:$0xff] %v120_v17  ;;  %p404_p11 = scmp.ne.s32.totalorder %s674_s24, %s403_s30  ;;  %p409_p13 = scmp.lt.s32.totalorder %s403_s30, %s403_s30 }
  0x45   :  { %301 = vrcp.f32 %v124_v13  ;;  %113 = vst [vmem:[#allocation11] sm:$0xff] %v111_v15  ;;  %vm695_vm7 = vmpackc.low %vm132_vm5, %vm131_vm3 }
  0x46   :  { %p410_p0 = por %p409_p13, %p408_p12 }
  0x48   :  { %p411_p1 = pnand %p410_p0, %p404_p11 }
  0x4a   :  { %414 = shalt.err (!%p411_p1)
}
  0x4b   :  { %193 = dma.vmem_to_hbm [thread:$0]  %s674_s24, 256, %s774_s6, [#allocation13], %s559_s22, %s559_s22, %s560_s23   ;;  %v149_v22 = vunpack.c.0.s8 %v148_v20  ;;  %v150_v23 = vunpack.c.1.s8 %v148_v20  ;;  %114 = vst [vmem:[#allocation11 + $0x8] sm:$0xff] %v112_v18  ;;  %vm134_vm9 = vmpackc.even %vm695_vm7, %vm695_vm7 }
  0x4c   :  { %s423_s1 = scalar_lea.vmem %s683_s27, 256  ;;  %p428_p3 = scmp.lt.s32.totalorder %s683_s27, %s683_s27 }
  0x4d   :  { %p424_p2 = scmp.ne.s32.totalorder %s683_s27, %s423_s1  ;;  %p429_p4 = scmp.lt.s32.totalorder %s423_s1, %s423_s1 }
  0x4f   :  { %p430_p5 = por %p429_p4, %p428_p3 }
  0x51   :  { %p431_p6 = pnand %p430_p5, %p424_p2 }
  0x53   :  { %434 = shalt.err (!%p431_p6)
}
  0x54   :  { %205 = dma.vmem_to_hbm [thread:$0]  %s683_s27, 256, %s775_s7, [#allocation13], %s559_s22, %s559_s22, %s560_s23   ;;  %v135_v24 = vsel %vm134_vm9, 16843009, %v568_v19  ;;  %vm159_vm10 = vmpackc.low %vm158_vm8, %vm157_vm6 }
  0x55   :  { %s443_s15 = scalar_lea.vmem %s692_s25, 256  ;;  %p448_p8 = scmp.lt.s32.totalorder %s692_s25, %s692_s25 }
  0x56   :  { %p444_p7 = scmp.ne.s32.totalorder %s692_s25, %s443_s15  ;;  %p449_p9 = scmp.lt.s32.totalorder %s443_s15, %s443_s15 }
  0x58   :  { %p450_p10 = por %p449_p9, %p448_p8 }
  0x5a   :  { %p451_p11 = pnand %p450_p10, %p444_p7 }
  0x5c   :  { %454 = shalt.err (!%p451_p11)
}
  0x5d   :  { %181 = dma.vmem_to_hbm [thread:$0]  %s692_s25, 256, %s773_s5, [#allocation4], %s559_s22, %s559_s22, %s560_s23   ;;  %v151_v25 = vpack.c.b16 %v149_v22, %v149_v22  ;;  %v153_v26 = vpack.c.b16 %v150_v23, %v150_v23  ;;  %v136_v27 = vunpack.c.0.s8 %v135_v24  ;;  %v137_v28 = vunpack.c.1.s8 %v135_v24  ;;  %vm160_vm11 = vmpackc.even %vm159_vm10, %vm159_vm10 }
  0x5e   :  { %v161_v29 = vsel %vm160_vm11, 16843009, %v568_v19  ;;  %s569_s16 = smov [#allocation20]   ;;  %s463_s5 = scalar_lea.vmem %s236_s29, 64 }
  0x5f   :  { %v152_v30 = vpack.c.b8 %v151_v25, %v151_v25  ;;  %v154_v31 = vpack.c.b8 %v153_v26, %v153_v26  ;;  %v138_v32 = vpack.c.b16 %v136_v27, %v136_v27  ;;  %v140_v33 = vpack.c.b16 %v137_v28, %v137_v28  ;;  %s247_s17 = sshll.u32 %s569_s16, 4  ;;  %p464_p12 = scmp.ne.s32.totalorder %s236_s29, %s463_s5  ;;  %s248_s17 = int_to_ptr.vmem [resolvable:$true] %s247_s17 }
  0x60   :  { %v162_v34 = vunpack.c.0.s8 %v161_v29  ;;  %v163_v35 = vunpack.c.1.s8 %v161_v29  ;;  %p468_p13 = scmp.lt.s32.totalorder %s236_s29, %s236_s29  ;;  %p469_p0 = scmp.lt.s32.totalorder %s463_s5, %s463_s5 }
  0x61   :  { %155 = vst [vmem:[#allocation18] sm:$0x3] %v152_v30  ;;  %156 = vst [vmem:[#allocation18 + $0x2] sm:$0x3] %v154_v31  ;;  %v139_v36 = vpack.c.b8 %v138_v32, %v138_v32  ;;  %v141_v37 = vpack.c.b8 %v140_v33, %v140_v33 }
  0x62   :  { %v164_v38 = vpack.c.b16 %v162_v34, %v162_v34  ;;  %v166_v39 = vpack.c.b16 %v163_v35, %v163_v35  ;;  %p470_p1 = por %p469_p0, %p468_p13 }
  0x64   :  { %p471_p2 = pnand %p470_p1, %p464_p12 }
  0x66   :  { %474 = shalt.err (!%p471_p2)
}
  0x67   :  { %s570_s18 = smov 32   ;;  %s571_s19 = smov 2   ;;  %142 = vst [vmem:[#allocation17] sm:$0x3] %v139_v36  ;;  %143 = vst [vmem:[#allocation17 + $0x2] sm:$0x3] %v141_v37  ;;  %v165_v40 = vpack.c.b8 %v164_v38, %v164_v38  ;;  %v167_v41 = vpack.c.b8 %v166_v39, %v166_v39  ;;  %v300_v42 = vpop.eup %299 }
  0x68   :  { %241 = dma.vmem_to_hbm [thread:$0]  %s236_s29, 64, %s778_s10, [#allocation19], %s570_s18, %s570_s18, %s571_s19   ;;  %v302_v43 = vpop.eup %301  ;;  %v126_v44 = vmul.f32 %v300_v42, %v667_v5 }
  0x69   :  { %s572_s21 = smov [#allocation15]   ;;  %168 = vst [vmem:[#allocation20] sm:$0x3] %v165_v40  ;;  %169 = vst [vmem:[#allocation20 + $0x2] sm:$0x3] %v167_v41  ;;  %s573_s24 = smov [#allocation17]  }
  0x6a   :  { %s211_s2 = sshll.u32 %s572_s21, 4  ;;  %s223_s4 = sshll.u32 %s573_s24, 4  ;;  %s212_s2 = int_to_ptr.vmem [resolvable:$true] %s211_s2  ;;  %s224_s4 = int_to_ptr.vmem [resolvable:$true] %s223_s4 }
  0x6b   :  { %s483_s25 = scalar_lea.vmem %s248_s17, 64  ;;  %p488_p4 = scmp.lt.s32.totalorder %s248_s17, %s248_s17 }
  0x6c   :  { %p484_p3 = scmp.ne.s32.totalorder %s248_s17, %s483_s25  ;;  %p489_p5 = scmp.lt.s32.totalorder %s483_s25, %s483_s25 }
  0x6e   :  { %p490_p6 = por %p489_p5, %p488_p4 }
  0x70   :  { %p491_p7 = pnand %p490_p6, %p484_p3 }
  0x72   :  { %494 = shalt.err (!%p491_p7)
}
  0x73   :  { %253 = dma.vmem_to_hbm [thread:$0]  %s248_s17, 64, %s779_s11, [#allocation19], %s570_s18, %s570_s18, %s571_s19   ;;  %v128_v45 = vmul.f32 %v302_v43, %v670_v9  ;;  %129 = vst [vmem:[#allocation15] sm:$0xff] %v126_v44 }
  0x74   :  { %s503_s27 = scalar_lea.vmem %s212_s2, 256  ;;  %p508_p9 = scmp.lt.s32.totalorder %s212_s2, %s212_s2 }
  0x75   :  { %130 = vst [vmem:[#allocation15 + $0x8] sm:$0xff] %v128_v45  ;;  %p504_p8 = scmp.ne.s32.totalorder %s212_s2, %s503_s27  ;;  %p509_p10 = scmp.lt.s32.totalorder %s503_s27, %s503_s27 }
  0x77   :  { %p510_p11 = por %p509_p10, %p508_p9 }
  0x79   :  { %p511_p12 = pnand %p510_p11, %p504_p8 }
  0x7b   :  { %514 = shalt.err (!%p511_p12)
}
  0x7c   :  { %217 = dma.vmem_to_hbm [thread:$0]  %s212_s2, 256, %s776_s8, [#allocation16], %s559_s22, %s559_s22, %s560_s23  }
  0x7d   :  { %s523_s11 = scalar_lea.vmem %s224_s4, 64  ;;  %p528_p0 = scmp.lt.s32.totalorder %s224_s4, %s224_s4 }
  0x7e   :  { %p524_p13 = scmp.ne.s32.totalorder %s224_s4, %s523_s11  ;;  %p529_p1 = scmp.lt.s32.totalorder %s523_s11, %s523_s11 }
  0x80   :  { %p530_p2 = por %p529_p1, %p528_p0 }
  0x82   :  { %p531_p3 = pnand %p530_p2, %p524_p13 }
  0x84   :  { %534 = shalt.err (!%p531_p3)
}
  0x85   :  { %229 = dma.vmem_to_hbm [thread:$0]  %s224_s4, 64, %s777_s9, [#allocation16], %s570_s18, %s570_s18, %s571_s19  }
  0x86   :  { %549 = dma.done.wait [#allocation4], 256  }
  0x87   :  { %550 = vsyncadd [#allocation4], 4294967040 }
  0x88   :  { %551 = dma.done.wait [#allocation13], 512  }
  0x89   :  { %552 = vsyncadd [#allocation13], 4294966784 }
  0x8a   :  { %553 = dma.done.wait [#allocation16], 320  }
  0x8b   :  { %554 = vsyncadd [#allocation16], 4294966976 }
  0x8c   :  { %555 = dma.done.wait [#allocation19], 128  }
  0x8d   :  { %556 = vsyncadd [#allocation19], 4294967168 }
  0x8e   :  { %275 = vsyncpa [#allocation3], 1 }
  0x8f   :  { %276 = vsyncpa [#allocation6], 1 }
  0x90   :  { %277 = vsyncpa [#allocation9], 1 }
  0x91   :  { %278 = vsyncpa [#allocation4], 1 }
  0x92   :  { %279 = vsyncpa [#allocation13], 1 }
  0x93   :  { %280 = vsyncpa [#allocation16], 1 }
  0x94   :  { %281 = vsyncpa [#allocation19], 1 }

</bundles_post_ra>
